<compile_context>
chip_gen: v7x
topology: tpu7x:2x2x1
jax: 0.10.0
libtpu: 0.0.40
codegen_flags: <defaults>
</compile_context>

<pallas_src>
import functools

import jax
import jax.numpy as jnp
from jax.experimental import pallas as pl
from jax.experimental.pallas import tpu as pltpu


def attention_kernel(x_ref, w_ref, b_ref, mask_ref, out_ref, *, n_head, n_embd):
    tm = x_ref.shape[0]
    HE = n_head * n_embd

    x = x_ref[...]                                              # (tm, E)

    # Fused c_attn | c_proj: one MXU pass with N = 2*H*E, f32 accumulation.
    # Single explicit bias broadcast-add per tile.
    h = jnp.dot(x, w_ref[...], preferred_element_type=jnp.float32) + b_ref[...]
    h_attn = h[:, :HE]                                          # (tm, H*E)
    h_proj = h[:, HE:]                                          # (tm, H*E)

    # Per-row (i.e. per (batch, position)) attention over the head axis,
    # matching torch.einsum('bhld,bhmd->bhml') on (b, l, h, d) tensors:
    # score[m, l] = sum_d ha[l, d] * hp[m, d] for each row r.
    # These are tiny (H x H, K=E) contractions per row -- deliberately left to
    # VPU/XLU lowering so the MXU is reserved for the big x@W matmul above.
    ha = h_attn.reshape(tm, n_head, n_embd)                     # (r, l, d)
    hp = h_proj.reshape(tm, n_head, n_embd)                     # (r, m, d)
    score = jnp.einsum('rld,rmd->rml', ha, hp,
                       preferred_element_type=jnp.float32)      # (tm, H, H)

    # Additive mask (0.0 attended / -1e9 masked), precomputed on host.
    score = score + mask_ref[...][None, :, :]

    # Explicit softmax over the last axis; divide replaced by EUP reciprocal
    # plus one Newton refinement step (restores ~f32 accuracy at VALU cost 2).
    m = jnp.max(score, axis=-1, keepdims=True)
    e = jnp.exp(score - m)
    denom = jnp.sum(e, axis=-1, keepdims=True)
    r = pl.reciprocal(denom, approx=True)
    r = r * (2.0 - denom * r)
    prob = e * r                                                # (tm, H, H)
    # TODO(synk): attn_dropout / resid_dropout are identity in eval mode; no
    # stochastic dropout is applied here.

    # torch.einsum('bhml,bhmd->bhld'): out[l, d] = sum_m prob[m, l] * hp[m, d]
    vec = jnp.einsum('rml,rmd->rld', prob, hp,
                     preferred_element_type=jnp.float32)        # (tm, H, E)

    out_ref[...] = vec.reshape(tm, HE).astype(out_ref.dtype)


def attention_forward(x, wa, ba, wp, bp, mask, *, n_head, tm=None, use_bf16=False):
    B, L, E = x.shape
    H = n_head
    HE = H * E
    rows = B * L

    # Row-tile size: as large as possible (<= 256) so the MXU M dimension is
    # filled and per-grid-step overhead (~0.35 us) is amortized. For this toy
    # shape (rows=16) this collapses to a single grid step.
    if tm is None:
        tm = min(256, rows)
    tm = max(8, ((tm + 7) // 8) * 8)          # sublane alignment
    rows_padded = pl.cdiv(rows, tm) * tm

    x_flat = x.reshape(rows, E).astype(jnp.float32)
    if rows_padded != rows:
        x_flat = jnp.pad(x_flat, ((0, rows_padded - rows), (0, 0)))

    # Fuse c_attn / c_proj weights into one (E, 2*H*E) operand (one MXU pass,
    # one resident weight buffer instead of two).
    w_fused = jnp.concatenate([wa.T, wp.T], axis=1)                     # (E, 2*HE)
    b_fused = jnp.concatenate([ba, bp]).reshape(1, 2 * HE).astype(jnp.float32)

    if use_bf16:
        # v6e/v7x: bf16 MXU inputs, f32 accumulation via preferred_element_type.
        x_flat = x_flat.astype(jnp.bfloat16)
        w_fused = w_fused.astype(jnp.bfloat16)
    else:
        w_fused = w_fused.astype(jnp.float32)

    # Additive float mask: 0.0 where attended, -1e9 where masked.
    mask_add = jnp.where(mask == 0, jnp.float32(-1e9), jnp.float32(0.0))

    kernel = functools.partial(attention_kernel, n_head=H, n_embd=E)

    grid = (rows_padded // tm,)
    flops = 2 * rows_padded * E * (2 * HE) + 2 * 2 * rows_padded * H * H * E
    cost = pl.CostEstimate(
        flops=flops,
        transcendentals=rows_padded * H * H,
        bytes_accessed=4 * (rows_padded * E + E * 2 * HE + 2 * HE
                            + H * H + rows_padded * HE),
    )

    out = pl.pallas_call(
        kernel,
        out_shape=jax.ShapeDtypeStruct((rows_padded, HE), x.dtype),
        grid_spec=pltpu.PrefetchScalarGridSpec(
            num_scalar_prefetch=0,
            grid=grid,
            in_specs=[
                pl.BlockSpec((tm, E), lambda i: (i, 0)),           # x rows
                pl.BlockSpec((E, 2 * HE), lambda i: (0, 0)),       # fused W^T
                pl.BlockSpec((1, 2 * HE), lambda i: (0, 0)),       # fused bias
                pl.BlockSpec((H, H), lambda i: (0, 0)),            # additive mask
            ],
            out_specs=pl.BlockSpec((tm, HE), lambda i: (i, 0)),
        ),
        compiler_params=pltpu.CompilerParams(
            dimension_semantics=("parallel",)),
        cost_estimate=cost,
    )(x_flat, w_fused, b_fused, mask_add)

    return out[:rows].reshape(B, L, HE)


def attention_reference(x, wa, ba, wp, bp, mask, *, n_head):
    """Pure-JAX re-implementation of the PyTorch forward (eval mode)."""
    B, L, E = x.shape
    h_attn = (x @ wa.T + ba).reshape(B, L, n_head, E)
    h_proj = (x @ wp.T + bp).reshape(B, L, n_head, E)
    score = jnp.einsum('bhld,bhmd->bhml', h_attn, h_proj)
    score = jnp.where(mask == 0, -1e9, score)
    prob = jax.nn.softmax(score, axis=-1)
    vec = jnp.einsum('bhml,bhmd->bhld', prob, h_proj)
    return vec.reshape(B, L, n_head * E)


if __name__ == "__main__":
    # small shapes consistent with the module
    B, L, E, H = 2, 8, 32, 4        # batch, seq (=n_ctx), n_embd, n_head

    key = jax.random.PRNGKey(0)
    kx, kwa, kba, kwp, kbp = jax.random.split(key, 5)

    x = jax.random.normal(kx, (B, L, E), dtype=jnp.float32)
    # nn.Linear(n_embd, n_head * n_embd): weight (H*E, E), bias (H*E,)
    wa = jax.random.normal(kwa, (H * E, E), dtype=jnp.float32) * (1.0 / jnp.sqrt(E))
    ba = jax.random.normal(kba, (H * E,), dtype=jnp.float32) * 0.02
    wp = jax.random.normal(kwp, (H * E, E), dtype=jnp.float32) * (1.0 / jnp.sqrt(E))
    bp = jax.random.normal(kbp, (H * E,), dtype=jnp.float32) * 0.02

    # mask broadcastable to the (B, L, H, H) score; lower-triangular over heads
    mask = jnp.tril(jnp.ones((H, H), dtype=jnp.int32))

    # f32 path: tight check vs reference
    out = attention_forward(x, wa, ba, wp, bp, mask, n_head=H)
    out = jax.block_until_ready(out)

    ref = attention_reference(x, wa, ba, wp, bp, mask, n_head=H)
    assert out.shape == (B, L, H * E)
    assert jnp.allclose(out, ref, atol=5e-4, rtol=5e-4), "mismatch vs reference"

    # bf16-MXU path (v6e/v7x option): sanity-check it compiles and runs
    out_bf16 = jax.block_until_ready(
        attention_forward(x, wa, ba, wp, bp, mask, n_head=H, use_bf16=True))
    assert out_bf16.shape == ref.shape
    assert bool(jnp.all(jnp.isfinite(out_bf16)))

    print("KERNEL_OK")
</pallas_src>

<mosaic_0001>
module attributes {stable_mosaic.version = 11 : i64} {
  func.func @attention_kernel(%arg0: i32, %arg1: memref<16x32xf32, #tpu.memory_space<vmem>>, %arg2: memref<32x256xf32, #tpu.memory_space<vmem>>, %arg3: memref<1x256xf32, #tpu.memory_space<vmem>>, %arg4: memref<4x4xf32, #tpu.memory_space<vmem>>, %arg5: memref<16x128xf32, #tpu.memory_space<vmem>>) attributes {dimension_semantics = [#tpu.dimension_semantics<parallel>], iteration_bounds = array<i64: 1>, scalar_prefetch = 0 : i64, scratch_operands = 0 : i64, tpu.core_type = #tpu.core_type<tc>, window_params = [{transform_indices = @transform_0, window_bounds = array<i64: 16, 32>}, {pipeline_mode = #tpu.pipeline_mode<synchronous>, transform_indices = @transform_1, window_bounds = array<i64: 32, 256>}, {pipeline_mode = #tpu.pipeline_mode<synchronous>, transform_indices = @transform_2, window_bounds = array<i64: 1, 256>}, {pipeline_mode = #tpu.pipeline_mode<synchronous>, transform_indices = @transform_3, window_bounds = array<i64: 4, 4>}, {transform_indices = @transform_4, window_bounds = array<i64: 16, 128>}]} {
    %c0 = arith.constant 0 : index
    %c0_0 = arith.constant 0 : index
    %0 = vector.load %arg1[%c0, %c0_0] : memref<16x32xf32, #tpu.memory_space<vmem>>, vector<16x32xf32>
    %c0_1 = arith.constant 0 : index
    %c0_2 = arith.constant 0 : index
    %1 = vector.load %arg2[%c0_1, %c0_2] : memref<32x256xf32, #tpu.memory_space<vmem>>, vector<32x256xf32>
    %cst = arith.constant dense<0.000000e+00> : vector<16x256xf32>
    %2 = tpu.matmul %0, %1, %cst {dimension_numbers = #tpu.dot_dimension_numbers<[1], [0], [0], [1], [0, 0, 1, 1], [], []>} : vector<16x32xf32>, vector<32x256xf32>, vector<16x256xf32> -> vector<16x256xf32>
    %c0_3 = arith.constant 0 : index
    %c0_4 = arith.constant 0 : index
    %3 = vector.load %arg3[%c0_3, %c0_4] : memref<1x256xf32, #tpu.memory_space<vmem>>, vector<1x256xf32>
    %4 = vector.broadcast %3 : vector<1x256xf32> to vector<16x256xf32>
    %5 = arith.addf %2, %4 : vector<16x256xf32>
    %6 = vector.extract_strided_slice %5 {offsets = [0, 0], sizes = [16, 128], strides = [1, 1]} : vector<16x256xf32> to vector<16x128xf32>
    %7 = vector.extract_strided_slice %5 {offsets = [0, 128], sizes = [16, 128], strides = [1, 1]} : vector<16x256xf32> to vector<16x128xf32>
    %8 = vector.shape_cast %6 : vector<16x128xf32> to vector<16x4x32xf32>
    %9 = vector.shape_cast %7 : vector<16x128xf32> to vector<16x4x32xf32>
    "tpu.trace_start"() <{level = 10 : i32, message = "rld,rmd->rml"}> : () -> ()
    %cst_5 = arith.constant dense<0.000000e+00> : vector<16x4x4xf32>
    %10 = tpu.matmul %9, %8, %cst_5 {dimension_numbers = #tpu.dot_dimension_numbers<[2], [2], [1], [1], [0, 0, 0, 1, 1, 1], [0], [0]>} : vector<16x4x32xf32>, vector<16x4x32xf32>, vector<16x4x4xf32> -> vector<16x4x4xf32>
    "tpu.trace_stop"() : () -> ()
    %c0_6 = arith.constant 0 : index
    %c0_7 = arith.constant 0 : index
    %11 = vector.load %arg4[%c0_6, %c0_7] : memref<4x4xf32, #tpu.memory_space<vmem>>, vector<4x4xf32>
    %12 = vector.shape_cast %11 : vector<4x4xf32> to vector<1x4x4xf32>
    %13 = vector.broadcast %12 : vector<1x4x4xf32> to vector<16x4x4xf32>
    %14 = arith.addf %10, %13 : vector<16x4x4xf32>
    %cst_8 = arith.constant dense<0xFF800000> : vector<16x4xf32>
    %15 = vector.multi_reduction <maximumf>, %14, %cst_8 [2] : vector<16x4x4xf32> to vector<16x4xf32>
    %16 = vector.shape_cast %15 : vector<16x4xf32> to vector<16x4x1xf32>
    %17 = vector.broadcast %16 : vector<16x4x1xf32> to vector<16x4x4xf32>
    %18 = arith.subf %14, %17 : vector<16x4x4xf32>
    %19 = math.exp %18 : vector<16x4x4xf32>
    %cst_9 = arith.constant dense<0.000000e+00> : vector<16x4xf32>
    %20 = vector.multi_reduction <add>, %19, %cst_9 [2] : vector<16x4x4xf32> to vector<16x4xf32>
    %21 = vector.shape_cast %20 : vector<16x4xf32> to vector<16x4x1xf32>
    %22 = tpu.reciprocal %21 {approx = true} : vector<16x4x1xf32> -> vector<16x4x1xf32>
    %23 = arith.mulf %21, %22 : vector<16x4x1xf32>
    %cst_10 = arith.constant 2.000000e+00 : f32
    %24 = vector.broadcast %cst_10 : f32 to vector<16x4x1xf32>
    %25 = arith.subf %24, %23 : vector<16x4x1xf32>
    %26 = arith.mulf %22, %25 : vector<16x4x1xf32>
    %27 = vector.broadcast %26 : vector<16x4x1xf32> to vector<16x4x4xf32>
    %28 = arith.mulf %19, %27 : vector<16x4x4xf32>
    "tpu.trace_start"() <{level = 10 : i32, message = "rml,rmd->rld"}> : () -> ()
    %cst_11 = arith.constant dense<0.000000e+00> : vector<16x4x32xf32>
    %29 = tpu.matmul %28, %9, %cst_11 {dimension_numbers = #tpu.dot_dimension_numbers<[1], [1], [2], [2], [0, 0, 0, 2, 1, 2], [0], [0]>} : vector<16x4x4xf32>, vector<16x4x32xf32>, vector<16x4x32xf32> -> vector<16x4x32xf32>
    "tpu.trace_stop"() : () -> ()
    %30 = vector.shape_cast %29 : vector<16x4x32xf32> to vector<16x128xf32>
    %c0_12 = arith.constant 0 : index
    %c0_13 = arith.constant 0 : index
    %31 = vector.load %arg5[%c0_12, %c0_13] : memref<16x128xf32, #tpu.memory_space<vmem>>, vector<16x128xf32>
    tpu.vector_store %arg5[%c0_12, %c0_13], %30 {strides = array<i32>} : memref<16x128xf32, #tpu.memory_space<vmem>>, vector<16x128xf32>,
    return
  }
  func.func @transform_0(%arg0: i32) -> (i32, i32) {
    %c0_i32 = arith.constant 0 : i32
    %c0_i32_0 = arith.constant 0 : i32
    return %arg0, %c0_i32 : i32, i32
  }
  func.func @transform_1(%arg0: i32) -> (i32, i32) {
    %c0_i32 = arith.constant 0 : i32
    %c0_i32_0 = arith.constant 0 : i32
    %c0_i32_1 = arith.constant 0 : i32
    return %c0_i32, %c0_i32_0 : i32, i32
  }
  func.func @transform_2(%arg0: i32) -> (i32, i32) {
    %c0_i32 = arith.constant 0 : i32
    %c0_i32_0 = arith.constant 0 : i32
    %c0_i32_1 = arith.constant 0 : i32
    return %c0_i32, %c0_i32_0 : i32, i32
  }
  func.func @transform_3(%arg0: i32) -> (i32, i32) {
    %c0_i32 = arith.constant 0 : i32
    %c0_i32_0 = arith.constant 0 : i32
    %c0_i32_1 = arith.constant 0 : i32
    return %c0_i32, %c0_i32_0 : i32, i32
  }
  func.func @transform_4(%arg0: i32) -> (i32, i32) {
    %c0_i32 = arith.constant 0 : i32
    %c0_i32_0 = arith.constant 0 : i32
    return %arg0, %c0_i32 : i32, i32
  }
}

</mosaic_0001>

<bundles_post_ra>
// kernel: tpu_custom_call.1
= control target key start
LH: loop header
LB: loop body
LE: loop exit
PB: predicated region body
PF: predicated region fallthrough
CT: control target
= control target key end

     0   :  { %9 = vsyncpa [#allocation3], 0  ;;  %s4863_s0 = inlined_call_operand.hbm [shape: f32[16,32], index: 0, kind: input, shape index: {}]   ;;  %s4864_s1 = inlined_call_operand.hbm [shape: f32[32,256], index: 1, kind: input, shape index: {}]   ;;  %s4865_s2 = inlined_call_operand.vmem [shape: f32[1,256], index: 2, kind: input, shape index: {}]   ;;  %s4866_s3 = inlined_call_operand.vmem [shape: f32[4,4], index: 3, kind: input, shape index: {}]   ;;  %s4867_s4 = inlined_call_operand.hbm [shape: f32[16,128], index: 4, kind: output, shape index: {}]  }
   0x1   :  { %10 = vsyncpa [#allocation6], 0 }
   0x2   :  { %11 = vsyncpa [#allocation4], 0  ;;  %s4256_s15 = smov [#allocation2]   ;;  %s4184_s19 = scalar_lea.hbm %s4863_s0, 256 }
   0x3   :  { %s17_s16 = sshll.u32 %s4256_s15, 4  ;;  %p4185_p0 = scmp.ne.s32.totalorder %s4863_s0, %s4184_s19  ;;  %s18_s16 = int_to_ptr.vmem [resolvable:$true] %s17_s16 }
   0x4   :  { %p4188_p1 = scmp.lt.u32.totalorder %s4184_s19, %s4863_s0 }
   0x6   :  { %p4190_p2 = pnand %p4188_p1, %p4185_p0 }
   0x8   :  { %4193 = shalt.err (!%p4190_p2)
}
   0x9   :  { %s4194_s24 = scalar_lea.vmem %s18_s16, 256  ;;  %p4199_p4 = scmp.lt.s32.totalorder %s18_s16, %s18_s16 }
   0xa   :  { %p4195_p3 = scmp.ne.s32.totalorder %s18_s16, %s4194_s24  ;;  %p4200_p5 = scmp.lt.s32.totalorder %s4194_s24, %s4194_s24 }
   0xc   :  { %p4201_p6 = por %p4200_p5, %p4199_p4 }
   0xe   :  { %p4202_p7 = pnand %p4201_p6, %p4195_p3 }
  0x10   :  { %4205 = shalt.err (!%p4202_p7)
}
  0x11   :  { %s4257_s25 = smov 128   ;;  %s4258_s26 = smov 8  }
  0x12   :  { %23 = dma.hbm_to_vmem [thread:$0]  %s4863_s0, 256, %s18_s16, [#allocation3], %s4257_s25, %s4257_s25, %s4258_s26  }
  0x13   :  { %s4259_s29 = smov [#allocation5]   ;;  %s4206_s7 = scalar_lea.hbm %s4864_s1, 1024 }
  0x14   :  { %s29_s30 = sshll.u32 %s4259_s29, 4  ;;  %p4207_p8 = scmp.ne.s32.totalorder %s4864_s1, %s4206_s7  ;;  %s30_s30 = int_to_ptr.vmem [resolvable:$true] %s29_s30 }
  0x15   :  { %p4210_p9 = scmp.lt.u32.totalorder %s4206_s7, %s4864_s1 }
  0x17   :  { %p4212_p10 = pnand %p4210_p9, %p4207_p8 }
  0x19   :  { %4215 = shalt.err (!%p4212_p10)
}
  0x1a   :  { %s4216_s12 = scalar_lea.vmem %s30_s30, 1024  ;;  %p4221_p12 = scmp.lt.s32.totalorder %s30_s30, %s30_s30 }
  0x1b   :  { %p4217_p11 = scmp.ne.s32.totalorder %s30_s30, %s4216_s12  ;;  %p4222_p13 = scmp.lt.s32.totalorder %s4216_s12, %s4216_s12 }
  0x1d   :  { %p4223_p0 = por %p4222_p13, %p4221_p12 }
  0x1f   :  { %p4224_p1 = pnand %p4223_p0, %p4217_p11 }
  0x21   :  { %4227 = shalt.err (!%p4224_p1)
}
  0x22   :  { %s4260_s0 = smov 256   ;;  %s4261_s13 = smov 16  }
  0x23   :  { %35 = dma.hbm_to_vmem [thread:$0]  %s4864_s1, 1024, %s30_s30, [#allocation6], %s4260_s0, %s4260_s0, %s4261_s13  }
  0x24   :  { %4250 = dma.done.wait [#allocation3], 256  }
  0x25   :  { %4251 = vsyncadd [#allocation3], 4294967040 }
  0x26   :  { %4252 = dma.done.wait [#allocation6], 1024  }
  0x27   :  { %4253 = vsyncadd [#allocation6], 4294966272  ;;  %v4262_v0 = vmov 0.0   ;;  %v49_v1 = vld [vmem:[#allocation5 + $0x8] sm:$0xff]  ;;  %v51_v2 = vld [vmem:[#allocation5 + $0x18] sm:$0xff]  ;;  %vm68_vm0 = vcmask 261120   ;;  %v58_v15 = vlaneseq }
  0x28   :  { %139 = vmatprep.mubr.f32.mxu0 %v4262_v0  ;;  %3938 = vmatprep.subr.mxu1 %v4262_v0  ;;  %v48_v3 = vld [vmem:[#allocation5] sm:$0xff]  ;;  %v4098_v4 = vpack.c.bf16 %v51_v2, %v49_v1  ;;  %v50_v5 = vld [vmem:[#allocation5 + $0x10] sm:$0xff]  ;;  %v53_v6 = vld [vmem:[#allocation5 + $0x28] sm:$0xff]  ;;  %s4263_s17 = smov 32   ;;  %s4264_s18 = smov 96   ;;  %vm4266_vm1 = vmmov 0  }
  0x29   :  { %v55_v7 = vld [vmem:[#allocation5 + $0x38] sm:$0xff]  ;;  %v4100_v8 = vpack.c.bf16 %v50_v5, %v48_v3  ;;  %v52_v10 = vld [vmem:[#allocation5 + $0x20] sm:$0xff]  ;;  %v54_v11 = vld [vmem:[#allocation5 + $0x30] sm:$0xff]  ;;  %v59_v16 = vshrl.u32 %v58_v15, 7  ;;  %s4265_s19 = smov 64   ;;  %3940 = vmatprep.mubr.msk.f32.mxu1 %vm4266_vm1, %v4262_v0  ;;  %vm1942_vm2 = vcmask 1043456  }
  0x2a   :  { %v4102_v9 = vpack.c.bf16 %v55_v7, %v53_v6  ;;  %4099 = vmatprep.subr.bf16.mxu0 %v4098_v4  ;;  %v4104_v12 = vpack.c.bf16 %v54_v11, %v52_v10  ;;  %v46_v13 = vld [vmem:[#allocation2] sm:$0xff]  ;;  %v47_v14 = vld [vmem:[#allocation2 + $0x8] sm:$0xff]  ;;  %v4267_v30 = vmov 1983009808   ;;  %v4268_v32 = vmov 1934713408  }
  0x2b   :  { %4101 = vmatpush1.bf16.msra.mxu0 %v4100_v8  ;;  %v60_v17 = vsub.s32 0, %v59_v16  ;;  %v56_v18 = vld [vmem:[%s4865_s2] sm:$0x3]  ;;  %v64_v20 = vsub.s32 1, %v59_v16  ;;  %v175_v31 = vunpack.c.l.s4 %v4267_v30  ;;  %v207_v33 = vunpack.c.l.s4 %v4268_v32 }
  0x2c   :  { %4103 = vmatprep.subr.bf16.mxu0 %v4102_v9  ;;  %vm1681_vm3 = vcmask 27648   ;;  %vm1938_vm4 = vcmask 31744   ;;  %vm3782_vm5 = vcmask 523264   ;;  %vm3785_vm6 = vcmask 785408  }
  0x2d   :  { %v61_v19 = vrot.slane %v56_v18, %v60_v17  ;;  %v65_v23 = vrot.slane %v56_v18, %v64_v20  ;;  %v176_v34 = vunpack.c.0.s8 %v175_v31  ;;  %v208_v37 = vunpack.c.0.s8 %v207_v33 }
  0x2f   :  { %4105 = vmatpush1.bf16.msra.mxu0 %v4104_v12  ;;  %v4357_v38 = vsub.s32 %v176_v34, %v59_v16  ;;  %v4359_v45 = vsub.s32 %v208_v37, %v59_v16 }
  0x30   :  { %3953 = vmatprep.subr.mxu0 %v4262_v0 }
  0x32   :  { %3808 = vmatmul.mubr.msk.f32.vlgmr.msra.gmra.mrb[0].mxu0 %vm68_vm0, %v46_v13 }
  0x33   :  { %145 = vmatprep.mubr.f32.mxu0 %v4262_v0 }
  0x36   :  { %3809 = vmatmul.mubr.msk.f32.gmra.mrb[2].mxu0 %vm68_vm0, %v47_v14 }
  0x37   :  { %3955 = vmatprep.mubr.msk.f32.mxu0 %vm4266_vm1, %v4262_v0 }
 0x105   :  { %v141_v21 = vpop.f32.mrb[0].mxu0 }
 0x106   :  { %v142_v22 = vadd.f32 %v141_v21, %v61_v19  ;;  %v143_v24 = vpop.f32.mrb[1].mxu0 }
 0x107   :  { %v144_v26 = vadd.f32 %v143_v24, %v65_v23 }
 0x108   :  { %166 = vrot.lane.b32.xlu1 %v142_v22, %s4263_s17  ;;  %154 = vrot.lane.b32.xlu0 %v142_v22, %s4264_s18 }
 0x109   :  { %v147_v25 = vpop.f32.mrb[2].mxu0 }
 0x10a   :  { %v149_v27 = vpop.f32.mrb[3].mxu0  ;;  %v4341_v28 = vadd.f32 %v147_v25, %v61_v19 }
 0x10b   :  { %v4347_v29 = vadd.f32 %v149_v27, %v65_v23 }
 0x10c   :  { %310 = vrot.lane.b32.xlu1 %v144_v26, %s4264_s18  ;;  %160 = vrot.lane.b32.xlu0 %v142_v22, %s4265_s19 }
 0x110   :  { %322 = vrot.lane.b32.xlu1 %v144_v26, %s4263_s17  ;;  %316 = vrot.lane.b32.xlu0 %v144_v26, %s4265_s19 }
 0x114   :  { %162 = vrot.lane.b32.xlu1 %v4341_v28, %s4265_s19  ;;  %156 = vrot.lane.b32.xlu0 %v4341_v28, %s4264_s18 }
 0x118   :  { %312 = vrot.lane.b32.xlu1 %v4347_v29, %s4264_s18  ;;  %168 = vrot.lane.b32.xlu0 %v4341_v28, %s4263_s17 }
 0x11c   :  { %324 = vrot.lane.b32.xlu1 %v4347_v29, %s4263_s17  ;;  %318 = vrot.lane.b32.xlu0 %v4347_v29, %s4265_s19 }
 0x17a   :  { %v167_v35 = vpop.permute.xlu1 %166  ;;  %v155_v36 = vpop.permute.xlu0 %154 }
 0x17b   :  { %v188_v39 = vcombine.low %v155_v36, %v167_v35  ;;  %v189_v40 = vcombine.high %v155_v36, %v167_v35 }
 0x17d   :  { %v196_v46 = vrot.slane %v188_v39, %v4357_v38  ;;  %v203_v47 = vrot.slane %v189_v40, %v4357_v38 }
 0x17e   :  { %v311_v41 = vpop.permute.xlu1 %310  ;;  %v161_v42 = vpop.permute.xlu0 %160 }
 0x17f   :  { %v172_v43 = vcombine.low %v142_v22, %v161_v42  ;;  %v173_v44 = vcombine.high %v142_v22, %v161_v42 }
 0x181   :  { %v180_v48 = vrot.slane %v172_v43, %v4357_v38  ;;  %v187_v49 = vrot.slane %v173_v44, %v4357_v38 }
 0x182   :  { %v323_v50 = vpop.permute.xlu1 %322  ;;  %v317_v51 = vpop.permute.xlu0 %316 }
 0x183   :  { %v204_v52 = vcombine.low %v180_v48, %v196_v46  ;;  %v205_v53 = vcombine.high %v180_v48, %v196_v46  ;;  %v220_v54 = vcombine.low %v187_v49, %v203_v47  ;;  %v344_v55 = vcombine.low %v311_v41, %v323_v50 }
 0x184   :  { %v345_v56 = vcombine.high %v311_v41, %v323_v50  ;;  %v328_v57 = vcombine.low %v144_v26, %v317_v51  ;;  %v329_v58 = vcombine.high %v144_v26, %v317_v51  ;;  %v221_v14 = vcombine.high %v187_v49, %v203_v47 }
 0x185   :  { %v219_v59 = vrot.slane %v205_v53, %v4359_v45  ;;  %v212_v60 = vrot.slane %v204_v52, %v4359_v45  ;;  %v352_v61 = vrot.slane %v344_v55, %v4357_v38  ;;  %v4374_v5 = vrot.slane %v220_v54, %v4359_v45 }
 0x186   :  { %v359_v62 = vrot.slane %v345_v56, %v4357_v38  ;;  %v336_v63 = vrot.slane %v328_v57, %v4357_v38  ;;  %v343_v1 = vrot.slane %v329_v58, %v4357_v38  ;;  %v163_v2 = vpop.permute.xlu1 %162  ;;  %v157_v3 = vpop.permute.xlu0 %156  ;;  %v235_v26 = vrot.slane %v221_v14, %v4359_v45 }
 0x187   :  { %v237_v4 = vcombine.high %v219_v59, %v4262_v0  ;;  %3939 = vmatpush3.xpose.msk.msra.mxu1 %vm68_vm0, %v212_v60  ;;  %v240_v8 = vcombine.low %v4341_v28, %v163_v2  ;;  %v236_v15 = vcombine.high %v212_v60, %v4262_v0  ;;  %v238_v17 = vcombine.high %v4374_v5, %v4262_v0 }
 0x188   :  { %v360_v6 = vcombine.low %v336_v63, %v352_v61  ;;  %v361_v7 = vcombine.high %v336_v63, %v352_v61  ;;  %3943 = vmatprep.subr.mxu1 %v4262_v0  ;;  %v376_v10 = vcombine.low %v343_v1, %v359_v62  ;;  %v377_v19 = vcombine.high %v343_v1, %v359_v62 }
 0x189   :  { %3954 = vmatpush3.xpose.msk.msra.mxu0 %vm68_vm0, %v237_v4  ;;  %v248_v20 = vrot.slane %v240_v8, %v4357_v38  ;;  %v241_v34 = vcombine.high %v4341_v28, %v163_v2  ;;  %v239_v40 = vcombine.high %v235_v26, %v4262_v0 }
 0x18a   :  { %v4380_v9 = vrot.slane %v361_v7, %v4359_v45  ;;  %v313_v11 = vpop.permute.xlu1 %312  ;;  %v169_v12 = vpop.permute.xlu0 %168  ;;  %v4383_v13 = vrot.slane %v360_v6, %v4359_v45  ;;  %3963 = vmatprep.subr.mxu0 %v4262_v0  ;;  %v4401_v22 = vrot.slane %v376_v10, %v4359_v45  ;;  %v4416_v33 = vrot.slane %v377_v19, %v4359_v45  ;;  %v4562_v6 = vld [vmem:[%s4866_s3] sm:$0xf]  ;;  %s4269_s3 = smov [#allocation7]  }
 0x18b   :  { %v256_v16 = vcombine.low %v157_v3, %v169_v12  ;;  %v257_v30 = vcombine.high %v157_v3, %v169_v12  ;;  %v255_v46 = vrot.slane %v241_v34, %v4357_v38  ;;  %s3795_s21 = sshll.u32 %s4269_s3, 4  ;;  %s3796_s21 = int_to_ptr.vmem [resolvable:$true] %s3795_s21 }
 0x18c   :  { %v4391_v18 = vcombine.high %v4380_v9, %v4262_v0  ;;  %3941 = vmatmul.mubr.msk.f32.vlgmr.msra.gmra.mrb[0].mxu1 %vm68_vm0, %v4383_v13  ;;  %v4408_v25 = vcombine.high %v4383_v13, %v4262_v0  ;;  %v4427_v39 = vcombine.high %v4401_v22, %v4262_v0  ;;  %v4446_v48 = vcombine.high %v4416_v33, %v4262_v0  ;;  %s4228_s22 = scalar_lea.vmem %s3796_s21, 256  ;;  %p4233_p3 = scmp.lt.s32.totalorder %s3796_s21, %s3796_s21 }
 0x18d   :  { %v264_v21 = vrot.slane %v256_v16, %v4357_v38  ;;  %3944 = vmatpush3.xpose.msk.msra.mxu1 %vm68_vm0, %v236_v15  ;;  %3945 = vmatprep.mubr.msk.f32.mxu1 %vm4266_vm1, %v4262_v0  ;;  %v271_v42 = vrot.slane %v257_v30, %v4357_v38  ;;  %p4229_p2 = scmp.ne.s32.totalorder %s3796_s21, %s4228_s22  ;;  %p4234_p4 = scmp.lt.s32.totalorder %s4228_s22, %s4228_s22 }
 0x18e   :  { %3956 = vmatmul.mubr.msk.f32.vlgmr.msra.gmra.mrb[4].mxu0 %vm68_vm0, %v4391_v18  ;;  %v325_v23 = vpop.permute.xlu1 %324  ;;  %3948 = vmatprep.subr.mxu1 %v4262_v0  ;;  %v319_v24 = vpop.permute.xlu0 %318 }
 0x18f   :  { %v272_v27 = vcombine.low %v248_v20, %v264_v21  ;;  %3964 = vmatpush3.xpose.msk.msra.mxu0 %vm68_vm0, %v238_v17  ;;  %v412_v31 = vcombine.low %v313_v11, %v325_v23  ;;  %v396_v32 = vcombine.low %v4347_v29, %v319_v24  ;;  %3965 = vmatprep.mubr.msk.f32.mxu0 %vm4266_vm1, %v4262_v0  ;;  %p4235_p5 = por %p4234_p4, %p4233_p3 }
 0x190   :  { %3946 = vmatmul.mubr.msk.f32.vlgmr.msra.gmra.mrb[2].mxu1 %vm68_vm0, %v4408_v25  ;;  %v413_v41 = vcombine.high %v313_v11, %v325_v23  ;;  %v397_v28 = vcombine.high %v4347_v29, %v319_v24  ;;  %3973 = vmatprep.subr.mxu0 %v4262_v0  ;;  %v273_v43 = vcombine.high %v248_v20, %v264_v21 }
 0x191   :  { %3949 = vmatpush3.xpose.msk.msra.mxu1 %vm68_vm0, %v219_v59  ;;  %v280_v35 = vrot.slane %v272_v27, %v4359_v45  ;;  %v420_v36 = vrot.slane %v412_v31, %v4357_v38  ;;  %v404_v37 = vrot.slane %v396_v32, %v4357_v38  ;;  %3950 = vmatprep.mubr.msk.f32.mxu1 %vm4266_vm1, %v4262_v0  ;;  %p4236_p6 = pnand %p4235_p5, %p4229_p2 }
 0x192   :  { %3966 = vmatmul.mubr.msk.f32.vlgmr.msra.gmra.mrb[6].mxu0 %vm68_vm0, %v4427_v39  ;;  %3958 = vmatprep.subr.mxu1 %v4262_v0  ;;  %v427_v49 = vrot.slane %v413_v41, %v4357_v38  ;;  %v411_v50 = vrot.slane %v397_v28, %v4357_v38  ;;  %v287_v52 = vrot.slane %v273_v43, %v4359_v45 }
 0x193   :  { %v428_v44 = vcombine.low %v404_v37, %v420_v36  ;;  %3974 = vmatpush3.xpose.msk.msra.mxu0 %vm68_vm0, %v239_v40  ;;  %v304_v47 = vcombine.high %v280_v35, %v4262_v0  ;;  %v429_v51 = vcombine.high %v404_v37, %v420_v36  ;;  %3975 = vmatprep.mubr.msk.f32.mxu0 %vm4266_vm1, %v4262_v0 }
 0x194   :  { %3951 = vmatmul.mubr.msk.f32.vlgmr.msra.gmra.mrb[4].mxu1 %vm68_vm0, %v4380_v9  ;;  %v288_v53 = vcombine.low %v255_v46, %v271_v42  ;;  %3983 = vmatprep.subr.mxu0 %v4262_v0  ;;  %v444_v56 = vcombine.low %v411_v50, %v427_v49  ;;  %v289_v57 = vcombine.high %v255_v46, %v271_v42 }
 0x195   :  { %v4441_v29 = vrot.slane %v428_v44, %v4359_v45  ;;  %3959 = vmatpush3.xpose.msk.msra.mxu1 %vm68_vm0, %v4374_v5  ;;  %3960 = vmatprep.mubr.msk.f32.mxu1 %vm4266_vm1, %v4262_v0  ;;  %v4469_v55 = vrot.slane %v429_v51, %v4359_v45  ;;  %v305_v59 = vcombine.high %v287_v52, %v4262_v0 }
 0x196   :  { %3976 = vmatmul.mubr.msk.f32.vlgmr.msra.gmra.mrb[8].mxu0 %vm68_vm0, %v4446_v48  ;;  %3968 = vmatprep.subr.mxu1 %v4262_v0  ;;  %v296_v58 = vrot.slane %v288_v53, %v4359_v45  ;;  %v445_v60 = vcombine.high %v411_v50, %v427_v49  ;;  %v4486_v61 = vrot.slane %v444_v56, %v4359_v45 }
 0x197   :  { %v4464_v54 = vcombine.high %v4441_v29, %v4262_v0  ;;  %3984 = vmatpush3.xpose.msk.msra.mxu0 %vm68_vm0, %v304_v47  ;;  %3985 = vmatprep.mubr.msk.f32.mxu0 %vm4266_vm1, %v4262_v0  ;;  %v4494_v62 = vcombine.high %v4469_v55, %v4262_v0  ;;  %v303_v63 = vrot.slane %v289_v57, %v4359_v45 }
 0x198   :  { %3961 = vmatmul.mubr.msk.f32.vlgmr.msra.gmra.mrb[6].mxu1 %vm68_vm0, %v4401_v22  ;;  %3993 = vmatprep.subr.mxu0 %v4262_v0  ;;  %v306_v1 = vcombine.high %v296_v58, %v4262_v0  ;;  %v4507_v2 = vrot.slane %v445_v60, %v4359_v45  ;;  %v4515_v3 = vcombine.high %v4486_v61, %v4262_v0 }
 0x199   :  { %3969 = vmatpush3.xpose.msk.msra.mxu1 %vm68_vm0, %v235_v26  ;;  %3970 = vmatprep.mubr.msk.f32.mxu1 %vm4266_vm1, %v4262_v0  ;;  %v307_v4 = vcombine.high %v303_v63, %v4262_v0 }
 0x19a   :  { %3986 = vmatmul.mubr.msk.f32.vlgmr.msra.gmra.mrb[10].mxu0 %vm68_vm0, %v4464_v54  ;;  %3978 = vmatprep.subr.mxu1 %v4262_v0  ;;  %v4532_v5 = vcombine.high %v4507_v2, %v4262_v0 }
 0x19b   :  { %3994 = vmatpush3.xpose.msk.msra.mxu0 %vm68_vm0, %v305_v59  ;;  %3995 = vmatprep.mubr.msk.f32.mxu0 %vm4266_vm1, %v4262_v0 }
 0x19c   :  { %3971 = vmatmul.mubr.msk.f32.vlgmr.msra.gmra.mrb[8].mxu1 %vm68_vm0, %v4416_v33  ;;  %4003 = vmatprep.subr.mxu0 %v4262_v0 }
 0x19d   :  { %3979 = vmatpush3.xpose.msk.msra.mxu1 %vm68_vm0, %v280_v35  ;;  %3980 = vmatprep.mubr.msk.f32.mxu1 %vm4266_vm1, %v4262_v0 }
 0x19e   :  { %3996 = vmatmul.mubr.msk.f32.vlgmr.msra.gmra.mrb[12].mxu0 %vm68_vm0, %v4494_v62  ;;  %3988 = vmatprep.subr.mxu1 %v4262_v0 }
 0x19f   :  { %4004 = vmatpush3.xpose.msk.msra.mxu0 %vm68_vm0, %v306_v1  ;;  %4005 = vmatprep.mubr.msk.f32.mxu0 %vm4266_vm1, %v4262_v0 }
 0x1a0   :  { %3981 = vmatmul.mubr.msk.f32.vlgmr.msra.gmra.mrb[10].mxu1 %vm68_vm0, %v4441_v29  ;;  %4013 = vmatprep.subr.mxu0 %v4262_v0 }
 0x1a1   :  { %3989 = vmatpush3.xpose.msk.msra.mxu1 %vm68_vm0, %v287_v52  ;;  %3990 = vmatprep.mubr.msk.f32.mxu1 %vm4266_vm1, %v4262_v0 }
 0x1a2   :  { %4006 = vmatmul.mubr.msk.f32.vlgmr.msra.gmra.mrb[14].mxu0 %vm68_vm0, %v4515_v3  ;;  %3998 = vmatprep.subr.mxu1 %v4262_v0 }
 0x1a3   :  { %4014 = vmatpush3.xpose.msk.msra.mxu0 %vm68_vm0, %v307_v4  ;;  %4015 = vmatprep.mubr.msk.f32.mxu0 %vm4266_vm1, %v4262_v0 }
 0x1a4   :  { %3991 = vmatmul.mubr.msk.f32.vlgmr.msra.gmra.mrb[12].mxu1 %vm68_vm0, %v4469_v55  ;;  %4023 = vmatprep.subr.mxu0 %v4262_v0 }
 0x1a5   :  { %3999 = vmatpush3.xpose.msk.msra.mxu1 %vm68_vm0, %v296_v58  ;;  %4000 = vmatprep.mubr.msk.f32.mxu1 %vm4266_vm1, %v4262_v0 }
 0x1a6   :  { %4016 = vmatmul.mubr.msk.f32.vlgmr.msra.gmra.mrb[16].mxu0 %vm68_vm0, %v4532_v5  ;;  %4008 = vmatprep.subr.mxu1 %v4262_v0 }
 0x1a7   :  { %4024 = vmatpush3.msk.msra.mxu0 %vm1942_vm2, %v4408_v25  ;;  %4025 = vmatprep.mubr.msk.f32.mxu0 %vm4266_vm1, %v4262_v0 }
 0x1a8   :  { %4001 = vmatmul.mubr.msk.f32.vlgmr.msra.gmra.mrb[14].mxu1 %vm68_vm0, %v4486_v61  ;;  %4033 = vmatprep.subr.mxu0 %v4262_v0 }
 0x1a9   :  { %4009 = vmatpush3.xpose.msk.msra.mxu1 %vm68_vm0, %v303_v63  ;;  %4010 = vmatprep.mubr.msk.f32.mxu1 %vm4266_vm1, %v4262_v0 }
 0x1aa   :  { %4018 = vmatprep.subr.mxu1 %v4262_v0 }
 0x1ac   :  { %4011 = vmatmul.mubr.msk.f32.vlgmr.msra.gmra.mrb[16].mxu1 %vm68_vm0, %v4507_v2 }
 0x1ad   :  { %4019 = vmatpush3.msk.msra.mxu1 %vm1942_vm2, %v4383_v13  ;;  %4020 = vmatprep.mubr.msk.f32.mxu1 %vm4266_vm1, %v4262_v0 }
 0x1ae   :  { %4028 = vmatprep.subr.mxu1 %v4262_v0 }
 0x25f   :  { %v537_v7 = vpop.f32.mrb[0].mxu1 }
 0x260   :  { %v4565_v8 = vadd.f32 %v537_v7, %v4562_v6  ;;  %v3942_v10 = vpop.f32.mrb[1].mxu1 }
 0x261   :  { %v765_v11 = vpop.f32.mrb[4].mxu0 }
 0x262   :  { %v4568_v12 = vadd.f32 %v765_v11, %v4562_v6  ;;  %v3957_v13 = vpop.f32.mrb[5].mxu0  ;;  %v1682_v14 = vsel %vm1681_vm3, %v4565_v8, -inf }
 0x263   :  { %1683 = vmax.xlane.f32.xlu0 %v1682_v14  ;;  %v613_v15 = vpop.f32.mrb[2].mxu1 }
 0x264   :  { %v4573_v16 = vadd.f32 %v613_v15, %v4562_v6  ;;  %v3947_v17 = vpop.f32.mrb[3].mxu1  ;;  %v1691_v19 = vsel %vm1681_vm3, %v4568_v12, -inf }
 0x265   :  { %v917_v21 = vpop.f32.mrb[6].mxu0 }
 0x266   :  { %v1685_v20 = vsel %vm1681_vm3, %v4573_v16, -inf  ;;  %v3967_v23 = vpop.f32.mrb[7].mxu0  ;;  %v4583_v30 = vadd.f32 %v917_v21, %v4562_v6 }
 0x267   :  { %1692 = vmax.xlane.f32.xlu0 %v1691_v19  ;;  %1686 = vmax.xlane.f32.xlu1 %v1685_v20  ;;  %v689_v24 = vpop.f32.mrb[4].mxu1 }
 0x268   :  { %v4580_v25 = vadd.f32 %v689_v24, %v4562_v6  ;;  %v3952_v26 = vpop.f32.mrb[5].mxu1  ;;  %v1697_v28 = vsel %vm1681_vm3, %v4583_v30, -inf }
 0x269   :  { %v1069_v27 = vpop.f32.mrb[8].mxu0 }
 0x26a   :  { %v3977_v31 = vpop.f32.mrb[9].mxu0  ;;  %v1688_v32 = vsel %vm1681_vm3, %v4580_v25, -inf  ;;  %v4591_v40 = vadd.f32 %v1069_v27, %v4562_v6 }
 0x26b   :  { %1689 = vmax.xlane.f32.xlu0 %v1688_v32  ;;  %v841_v34 = vpop.f32.mrb[6].mxu1 }
 0x26c   :  { %v4588_v35 = vadd.f32 %v841_v34, %v4562_v6  ;;  %v3962_v36 = vpop.f32.mrb[7].mxu1  ;;  %v1703_v51 = vsel %vm1681_vm3, %v4591_v40, -inf }
 0x26d   :  { %v1221_v37 = vpop.f32.mrb[10].mxu0 }
 0x26e   :  { %v3987_v41 = vpop.f32.mrb[11].mxu0  ;;  %v1694_v42 = vsel %vm1681_vm3, %v4588_v35, -inf  ;;  %v4601_v49 = vadd.f32 %v1221_v37, %v4562_v6 }
 0x26f   :  { %1698 = vmax.xlane.f32.xlu0 %v1697_v28  ;;  %1695 = vmax.xlane.f32.xlu1 %v1694_v42  ;;  %v993_v43 = vpop.f32.mrb[8].mxu1 }
 0x270   :  { %v4598_v44 = vadd.f32 %v993_v43, %v4562_v6  ;;  %v3972_v46 = vpop.f32.mrb[9].mxu1  ;;  %v1709_v1 = vsel %vm1681_vm3, %v4601_v49, -inf }
 0x271   :  { %v1373_v47 = vpop.f32.mrb[12].mxu0 }
 0x272   :  { %v3997_v50 = vpop.f32.mrb[13].mxu0  ;;  %v1700_v52 = vsel %vm1681_vm3, %v4598_v44, -inf  ;;  %v4611_v59 = vadd.f32 %v1373_v47, %v4562_v6 }
 0x273   :  { %1704 = vmax.xlane.f32.xlu0 %v1703_v51  ;;  %1701 = vmax.xlane.f32.xlu1 %v1700_v52  ;;  %v1145_v53 = vpop.f32.mrb[10].mxu1 }
 0x274   :  { %v4608_v56 = vadd.f32 %v1145_v53, %v4562_v6  ;;  %v3982_v57 = vpop.f32.mrb[11].mxu1  ;;  %v1715_v17 = vsel %vm1681_vm3, %v4611_v59, -inf }
 0x275   :  { %v1525_v58 = vpop.f32.mrb[14].mxu0 }
 0x276   :  { %v4007_v60 = vpop.f32.mrb[15].mxu0  ;;  %v1706_v63 = vsel %vm1681_vm3, %v4608_v56, -inf  ;;  %v4621_v13 = vadd.f32 %v1525_v58, %v4562_v6 }
 0x277   :  { %1707 = vmax.xlane.f32.xlu1 %v1706_v63  ;;  %v1297_v4 = vpop.f32.mrb[12].mxu1  ;;  %1710 = vmax.xlane.f32.xlu0 %v1709_v1 }
 0x278   :  { %v4618_v7 = vadd.f32 %v1297_v4, %v4562_v6  ;;  %v3992_v10 = vpop.f32.mrb[13].mxu1  ;;  %v1721_v26 = vsel %vm1681_vm3, %v4621_v13, -inf }
 0x279   :  { %v1677_v11 = vpop.f32.mrb[16].mxu0 }
 0x27a   :  { %v4017_v14 = vpop.f32.mrb[17].mxu0  ;;  %v1712_v15 = vsel %vm1681_vm3, %v4618_v7, -inf  ;;  %v4631_v23 = vadd.f32 %v1677_v11, %v4562_v6 }
 0x27b   :  { %1713 = vmax.xlane.f32.xlu1 %v1712_v15  ;;  %v1449_v19 = vpop.f32.mrb[14].mxu1  ;;  %1716 = vmax.xlane.f32.xlu0 %v1715_v17 }
 0x27c   :  { %v4628_v20 = vadd.f32 %v1449_v19, %v4562_v6  ;;  %v4002_v21 = vpop.f32.mrb[15].mxu1  ;;  %v1727_v36 = vsel %vm1681_vm3, %v4631_v23, -inf }
 0x27e   :  { %v1718_v24 = vsel %vm1681_vm3, %v4628_v20, -inf }
 0x27f   :  { %1719 = vmax.xlane.f32.xlu1 %v1718_v24  ;;  %v1601_v27 = vpop.f32.mrb[16].mxu1  ;;  %1722 = vmax.xlane.f32.xlu0 %v1721_v26 }
 0x280   :  { %v4638_v31 = vadd.f32 %v1601_v27, %v4562_v6  ;;  %v4012_v32 = vpop.f32.mrb[17].mxu1 }
 0x282   :  { %v1724_v34 = vsel %vm1681_vm3, %v4638_v31, -inf }
 0x283   :  { %1725 = vmax.xlane.f32.xlu1 %v1724_v34  ;;  %1728 = vmax.xlane.f32.xlu0 %v1727_v36 }
 0x2f0   :  { %v1684_v37 = vpop.xlane.xlu0 %1683 }
 0x2f1   :  { %v1730_v41 = vsub.f32 %v4565_v8, %v1684_v37 }
 0x2f3   :  { %v1746_v28 = vmul.f32 1.442695, %v1730_v41 }
 0x2f4   :  { %v1687_v42 = vpop.xlane.xlu1 %1686  ;;  %v1693_v43 = vpop.xlane.xlu0 %1692 }
 0x2f5   :  { %4120 = vpow2.f32 %v1746_v28  ;;  %v1731_v46 = vsub.f32 %v4573_v16, %v1687_v42  ;;  %v1733_v6 = vsub.f32 %v4568_v12, %v1693_v43 }
 0x2f7   :  { %v1748_v47 = vmul.f32 1.442695, %v1731_v46  ;;  %v1752_v50 = vmul.f32 1.442695, %v1733_v6 }
 0x2f8   :  { %v1690_v51 = vpop.xlane.xlu0 %1689 }
 0x2f9   :  { %4122 = vpow2.f32 %v1748_v47  ;;  %v1732_v52 = vsub.f32 %v4580_v25, %v1690_v51 }
 0x2fa   :  { %4124 = vpow2.f32 %v1752_v50 }
 0x2fb   :  { %v1750_v53 = vmul.f32 1.442695, %v1732_v52 }
 0x2fc   :  { %v1696_v58 = vpop.xlane.xlu1 %1695  ;;  %v1699_v8 = vpop.xlane.xlu0 %1698 }
 0x2fd   :  { %4126 = vpow2.f32 %v1750_v53  ;;  %v1734_v60 = vsub.f32 %v4588_v35, %v1696_v58  ;;  %v1735_v63 = vsub.f32 %v4583_v30, %v1699_v8 }
 0x2ff   :  { %v4648_v57 = vpop.eup %4120  ;;  %v1754_v16 = vmul.f32 1.442695, %v1734_v60  ;;  %v1756_v1 = vmul.f32 1.442695, %v1735_v63 }
 0x300   :  { %v1778_v12 = vsel %vm1681_vm3, %v4648_v57, 0.0  ;;  %v1702_v10 = vpop.xlane.xlu1 %1701  ;;  %v1705_v25 = vpop.xlane.xlu0 %1704 }
 0x301   :  { %1779 = vadd.xlane.f32.xlu1 %v1778_v12  ;;  %4128 = vpow2.f32 %v1754_v16  ;;  %v1736_v11 = vsub.f32 %v4598_v44, %v1702_v10  ;;  %v1737_v14 = vsub.f32 %v4591_v40, %v1705_v25 }
 0x302   :  { %4130 = vpow2.f32 %v1756_v1 }
 0x303   :  { %v4654_v4 = vpop.eup %4122  ;;  %v1758_v30 = vmul.f32 1.442695, %v1736_v11  ;;  %v1760_v17 = vmul.f32 1.442695, %v1737_v14 }
 0x304   :  { %v1781_v35 = vsel %vm1681_vm3, %v4654_v4, 0.0  ;;  %v4660_v15 = vpop.eup %4124  ;;  %v1708_v19 = vpop.xlane.xlu1 %1707 }
 0x305   :  { %1782 = vadd.xlane.f32.xlu0 %v1781_v35  ;;  %v1711_v21 = vpop.xlane.xlu0 %1710  ;;  %4132 = vpow2.f32 %v1758_v30  ;;  %v1738_v24 = vsub.f32 %v4608_v56, %v1708_v19  ;;  %v1787_v44 = vsel %vm1681_vm3, %v4660_v15, 0.0 }
 0x306   :  { %v1739_v26 = vsub.f32 %v4601_v49, %v1711_v21  ;;  %4134 = vpow2.f32 %v1760_v17 }
 0x307   :  { %v4666_v40 = vpop.eup %4126  ;;  %v1762_v27 = vmul.f32 1.442695, %v1738_v24 }
 0x308   :  { %v1764_v32 = vmul.f32 1.442695, %v1739_v26  ;;  %v1714_v34 = vpop.xlane.xlu1 %1713  ;;  %v1784_v37 = vsel %vm1681_vm3, %v4666_v40, 0.0 }
 0x309   :  { %1788 = vadd.xlane.f32.xlu0 %v1787_v44  ;;  %v1717_v36 = vpop.xlane.xlu0 %1716  ;;  %4136 = vpow2.f32 %v1762_v27  ;;  %v1740_v41 = vsub.f32 %v4618_v7, %v1714_v34  ;;  %1785 = vadd.xlane.f32.xlu1 %v1784_v37 }
 0x30a   :  { %v1741_v56 = vsub.f32 %v4611_v59, %v1717_v36  ;;  %4138 = vpow2.f32 %v1764_v32 }
 0x30b   :  { %v4672_v49 = vpop.eup %4128  ;;  %v1766_v28 = vmul.f32 1.442695, %v1740_v41 }
 0x30c   :  { %v1768_v42 = vmul.f32 1.442695, %v1741_v56  ;;  %v4674_v43 = vpop.eup %4130  ;;  %v1720_v46 = vpop.xlane.xlu1 %1719  ;;  %v1790_v47 = vsel %vm1681_vm3, %v4672_v49, 0.0 }
 0x30d   :  { %v1723_v6 = vpop.xlane.xlu0 %1722  ;;  %4140 = vpow2.f32 %v1766_v28  ;;  %v1742_v50 = vsub.f32 %v4628_v20, %v1720_v46  ;;  %1791 = vadd.xlane.f32.xlu1 %v1790_v47  ;;  %v1793_v59 = vsel %vm1681_vm3, %v4674_v43, 0.0 }
 0x30e   :  { %v1743_v7 = vsub.f32 %v4621_v13, %v1723_v6  ;;  %4142 = vpow2.f32 %v1768_v42  ;;  %1794 = vadd.xlane.f32.xlu0 %v1793_v59 }
 0x30f   :  { %v4682_v51 = vpop.eup %4132  ;;  %v1770_v52 = vmul.f32 1.442695, %v1742_v50 }
 0x310   :  { %v1772_v53 = vmul.f32 1.442695, %v1743_v7  ;;  %v4684_v58 = vpop.eup %4134  ;;  %v1726_v8 = vpop.xlane.xlu1 %1725  ;;  %v1796_v63 = vsel %vm1681_vm3, %v4682_v51, 0.0 }
 0x311   :  { %v1729_v60 = vpop.xlane.xlu0 %1728  ;;  %4144 = vpow2.f32 %v1770_v52  ;;  %v1744_v13 = vsub.f32 %v4638_v31, %v1726_v8  ;;  %1797 = vadd.xlane.f32.xlu1 %v1796_v63  ;;  %v1799_v12 = vsel %vm1681_vm3, %v4684_v58, 0.0 }
 0x312   :  { %v1745_v20 = vsub.f32 %v4631_v23, %v1729_v60  ;;  %4146 = vpow2.f32 %v1772_v53  ;;  %1800 = vadd.xlane.f32.xlu0 %v1799_v12 }
 0x313   :  { %v4692_v16 = vpop.eup %4136  ;;  %v1774_v1 = vmul.f32 1.442695, %v1744_v13 }
 0x314   :  { %v1776_v10 = vmul.f32 1.442695, %v1745_v20  ;;  %v4694_v25 = vpop.eup %4138  ;;  %v1802_v11 = vsel %vm1681_vm3, %v4692_v16, 0.0 }
 0x315   :  { %4148 = vpow2.f32 %v1774_v1  ;;  %1803 = vadd.xlane.f32.xlu1 %v1802_v11  ;;  %v1805_v23 = vsel %vm1681_vm3, %v4694_v25, 0.0 }
 0x316   :  { %4150 = vpow2.f32 %v1776_v10  ;;  %1806 = vadd.xlane.f32.xlu0 %v1805_v23 }
 0x317   :  { %v4700_v31 = vpop.eup %4140 }
 0x318   :  { %v4702_v14 = vpop.eup %4142  ;;  %v1808_v35 = vsel %vm1681_vm3, %v4700_v31, 0.0 }
 0x319   :  { %1809 = vadd.xlane.f32.xlu1 %v1808_v35  ;;  %v1811_v30 = vsel %vm1681_vm3, %v4702_v14, 0.0 }
 0x31a   :  { %1812 = vadd.xlane.f32.xlu0 %v1811_v30 }
 0x31b   :  { %v4708_v17 = vpop.eup %4144 }
 0x31c   :  { %v4710_v19 = vpop.eup %4146  ;;  %v1814_v21 = vsel %vm1681_vm3, %v4708_v17, 0.0 }
 0x31d   :  { %1815 = vadd.xlane.f32.xlu1 %v1814_v21  ;;  %v1817_v24 = vsel %vm1681_vm3, %v4710_v19, 0.0 }
 0x31e   :  { %1818 = vadd.xlane.f32.xlu0 %v1817_v24 }
 0x31f   :  { %v4716_v26 = vpop.eup %4148 }
 0x320   :  { %v4718_v44 = vpop.eup %4150  ;;  %v1820_v27 = vsel %vm1681_vm3, %v4716_v26, 0.0 }
 0x321   :  { %1821 = vadd.xlane.f32.xlu1 %v1820_v27  ;;  %v1823_v32 = vsel %vm1681_vm3, %v4718_v44, 0.0 }
 0x322   :  { %1824 = vadd.xlane.f32.xlu0 %v1823_v32 }
 0x38e   :  { %v1780_v34 = vpop.xlane.xlu1 %1779 }
 0x38f   :  { %4152 = vrcp.f32 %v1780_v34 }
 0x392   :  { %v1783_v36 = vpop.xlane.xlu0 %1782 }
 0x393   :  { %4154 = vrcp.f32 %v1783_v36 }
 0x396   :  { %v1789_v37 = vpop.xlane.xlu0 %1788  ;;  %v1786_v56 = vpop.xlane.xlu1 %1785 }
 0x397   :  { %4156 = vrcp.f32 %v1789_v37 }
 0x398   :  { %4158 = vrcp.f32 %v1786_v56 }
 0x399   :  { %v4153_v41 = vpop.eup %4152 }
 0x39a   :  { %v1842_v28 = vmul.f32 %v4153_v41, %v1780_v34  ;;  %v1792_v6 = vpop.xlane.xlu1 %1791 }
 0x39b   :  { %4160 = vrcp.f32 %v1792_v6  ;;  %v1795_v50 = vpop.xlane.xlu0 %1794 }
 0x39c   :  { %v1858_v42 = vsub.f32 2.0, %v1842_v28  ;;  %4162 = vrcp.f32 %v1795_v50 }
 0x39d   :  { %v4155_v46 = vpop.eup %4154 }
 0x39e   :  { %v1843_v47 = vmul.f32 %v4155_v46, %v1783_v36  ;;  %v1874_v7 = vmul.f32 %v4153_v41, %v1858_v42  ;;  %v1798_v8 = vpop.xlane.xlu1 %1797 }
 0x39f   :  { %4164 = vrcp.f32 %v1798_v8  ;;  %v1801_v63 = vpop.xlane.xlu0 %1800 }
 0x3a0   :  { %v1859_v59 = vsub.f32 2.0, %v1843_v47  ;;  %v1890_v52 = vmul.f32 %v4648_v57, %v1874_v7  ;;  %4166 = vrcp.f32 %v1801_v63 }
 0x3a1   :  { %v4157_v53 = vpop.eup %4156 }
 0x3a2   :  { %v1845_v60 = vmul.f32 %v4157_v53, %v1789_v37  ;;  %1906 = vxpose.xlu1.b32.start.end [1/1] (short) (narrow) %v1890_v52, 8  ;;  %v1875_v13 = vmul.f32 %v4155_v46, %v1859_v59  ;;  %v4159_v20 = vpop.eup %4158  ;;  %v1804_v11 = vpop.xlane.xlu1 %1803 }
 0x3a3   :  { %v1844_v10 = vmul.f32 %v4159_v20, %v1786_v56  ;;  %4168 = vrcp.f32 %v1804_v11  ;;  %v1807_v23 = vpop.xlane.xlu0 %1806 }
 0x3a4   :  { %v1861_v12 = vsub.f32 2.0, %v1845_v60  ;;  %v1891_v1 = vmul.f32 %v4654_v4, %v1875_v13  ;;  %4170 = vrcp.f32 %v1807_v23 }
 0x3a5   :  { %v1860_v30 = vsub.f32 2.0, %v1844_v10  ;;  %v4161_v57 = vpop.eup %4160 }
 0x3a6   :  { %2015 = vxpose.xlu0.b32.start.end [1/1] (short) (narrow) %v1891_v1, 8  ;;  %v1877_v35 = vmul.f32 %v4157_v53, %v1861_v12  ;;  %v4163_v24 = vpop.eup %4162  ;;  %v1846_v27 = vmul.f32 %v4161_v57, %v1792_v6  ;;  %v1810_v32 = vpop.xlane.xlu1 %1809 }
 0x3a7   :  { %v1876_v34 = vmul.f32 %v4159_v20, %v1860_v30  ;;  %v1847_v36 = vmul.f32 %v4163_v24, %v1795_v50  ;;  %4172 = vrcp.f32 %v1810_v32  ;;  %v1813_v37 = vpop.xlane.xlu0 %1812 }
 0x3a8   :  { %v1893_v21 = vmul.f32 %v4660_v15, %v1877_v35  ;;  %v1862_v4 = vsub.f32 2.0, %v1846_v27  ;;  %4174 = vrcp.f32 %v1813_v37 }
 0x3a9   :  { %v1892_v41 = vmul.f32 %v4666_v40, %v1876_v34  ;;  %v4165_v56 = vpop.eup %4164  ;;  %v1863_v28 = vsub.f32 2.0, %v1847_v36 }
 0x3aa   :  { %2229 = vxpose.xlu1.b32.start.end [1/1] (short) (narrow) %v1893_v21, 8  ;;  %v4167_v42 = vpop.eup %4166  ;;  %v1848_v46 = vmul.f32 %v4165_v56, %v1798_v8  ;;  %v1816_v47 = vpop.xlane.xlu1 %1815  ;;  %v1878_v7 = vmul.f32 %v4161_v57, %v1862_v4 }
 0x3ab   :  { %2122 = vxpose.xlu0.b32.start.end [1/1] (short) (narrow) %v1892_v41, 8  ;;  %v1849_v15 = vmul.f32 %v4167_v42, %v1801_v63  ;;  %4176 = vrcp.f32 %v1816_v47  ;;  %v1819_v6 = vpop.xlane.xlu0 %1818  ;;  %v1879_v59 = vmul.f32 %v4163_v24, %v1863_v28 }
 0x3ac   :  { %v1864_v52 = vsub.f32 2.0, %v1848_v46  ;;  %4178 = vrcp.f32 %v1819_v6  ;;  %v1894_v50 = vmul.f32 %v4672_v49, %v1878_v7 }
 0x3ad   :  { %v4169_v53 = vpop.eup %4168  ;;  %v1865_v60 = vsub.f32 2.0, %v1849_v15  ;;  %v1895_v13 = vmul.f32 %v4674_v43, %v1879_v59 }
 0x3ae   :  { %v4171_v40 = vpop.eup %4170  ;;  %v1850_v20 = vmul.f32 %v4169_v53, %v1804_v11  ;;  %v1822_v12 = vpop.xlane.xlu1 %1821  ;;  %v1880_v8 = vmul.f32 %v4165_v56, %v1864_v52 }
 0x3af   :  { %2336 = vxpose.xlu0.b32.start.end [1/1] (short) (narrow) %v1894_v50, 8  ;;  %v1851_v1 = vmul.f32 %v4171_v40, %v1807_v23  ;;  %4180 = vrcp.f32 %v1822_v12  ;;  %2443 = vxpose.xlu1.b32.start.end [1/1] (short) (narrow) %v1895_v13, 8  ;;  %v1825_v63 = vpop.xlane.xlu0 %1824  ;;  %v1881_v10 = vmul.f32 %v4167_v42, %v1865_v60 }
 0x3b0   :  { %v1866_v35 = vsub.f32 2.0, %v1850_v20  ;;  %4182 = vrcp.f32 %v1825_v63  ;;  %v1896_v30 = vmul.f32 %v4682_v51, %v1880_v8 }
 0x3b1   :  { %v4173_v57 = vpop.eup %4172  ;;  %v1867_v49 = vsub.f32 2.0, %v1851_v1  ;;  %v1897_v21 = vmul.f32 %v4684_v58, %v1881_v10 }
 0x3b2   :  { %v4175_v24 = vpop.eup %4174  ;;  %v1852_v43 = vmul.f32 %v4173_v57, %v1810_v32  ;;  %v1882_v11 = vmul.f32 %v4169_v53, %v1866_v35 }
 0x3b3   :  { %2550 = vxpose.xlu0.b32.start.end [1/1] (short) (narrow) %v1896_v30, 8  ;;  %v1853_v27 = vmul.f32 %v4175_v24, %v1813_v37  ;;  %2657 = vxpose.xlu1.b32.start.end [1/1] (short) (narrow) %v1897_v21, 8  ;;  %v1883_v34 = vmul.f32 %v4171_v40, %v1867_v49 }
 0x3b4   :  { %v1868_v23 = vsub.f32 2.0, %v1852_v43  ;;  %v1898_v36 = vmul.f32 %v4692_v16, %v1882_v11 }
 0x3b5   :  { %v4177_v4 = vpop.eup %4176  ;;  %v1869_v41 = vsub.f32 2.0, %v1853_v27  ;;  %v1899_v56 = vmul.f32 %v4694_v25, %v1883_v34 }
 0x3b6   :  { %v4179_v28 = vpop.eup %4178  ;;  %v1854_v51 = vmul.f32 %v4177_v4, %v1816_v47  ;;  %v1884_v42 = vmul.f32 %v4173_v57, %v1868_v23 }
 0x3b7   :  { %2764 = vxpose.xlu0.b32.start.end [1/1] (short) (narrow) %v1898_v36, 8  ;;  %v1855_v46 = vmul.f32 %v4179_v28, %v1819_v6  ;;  %2871 = vxpose.xlu1.b32.start.end [1/1] (short) (narrow) %v1899_v56, 8  ;;  %v1885_v58 = vmul.f32 %v4175_v24, %v1869_v41 }
 0x3b8   :  { %v1870_v32 = vsub.f32 2.0, %v1854_v51  ;;  %v1900_v7 = vmul.f32 %v4700_v31, %v1884_v42 }
 0x3b9   :  { %v4181_v37 = vpop.eup %4180  ;;  %v1871_v15 = vsub.f32 2.0, %v1855_v46  ;;  %v1901_v59 = vmul.f32 %v4702_v14, %v1885_v58 }
 0x3ba   :  { %v4183_v52 = vpop.eup %4182  ;;  %v1856_v16 = vmul.f32 %v4181_v37, %v1822_v12  ;;  %v1886_v50 = vmul.f32 %v4177_v4, %v1870_v32 }
 0x3bb   :  { %2978 = vxpose.xlu0.b32.start.end [1/1] (short) (narrow) %v1900_v7, 8  ;;  %v1857_v53 = vmul.f32 %v4183_v52, %v1825_v63  ;;  %3085 = vxpose.xlu1.b32.start.end [1/1] (short) (narrow) %v1901_v59, 8  ;;  %v1887_v25 = vmul.f32 %v4179_v28, %v1871_v15 }
 0x3bc   :  { %v1872_v47 = vsub.f32 2.0, %v1856_v16  ;;  %v1902_v60 = vmul.f32 %v4708_v17, %v1886_v50 }
 0x3bd   :  { %v1873_v6 = vsub.f32 2.0, %v1857_v53  ;;  %v1903_v13 = vmul.f32 %v4710_v19, %v1887_v25 }
 0x3be   :  { %v1888_v40 = vmul.f32 %v4181_v37, %v1872_v47 }
 0x3bf   :  { %3192 = vxpose.xlu0.b32.start.end [1/1] (short) (narrow) %v1902_v60, 8  ;;  %3299 = vxpose.xlu1.b32.start.end [1/1] (short) (narrow) %v1903_v13, 8  ;;  %v1889_v31 = vmul.f32 %v4183_v52, %v1873_v6 }
 0x3c0   :  { %v1904_v20 = vmul.f32 %v4716_v26, %v1888_v40 }
 0x3c1   :  { %v1905_v14 = vmul.f32 %v4718_v44, %v1889_v31 }
 0x3c3   :  { %3406 = vxpose.xlu0.b32.start.end [1/1] (short) (narrow) %v1904_v20, 8  ;;  %3513 = vxpose.xlu1.b32.start.end [1/1] (short) (narrow) %v1905_v14, 8 }
 0x422   :  { %v1922_v12 = vpop.trf.xlu1 }
 0x423   :  { %4021 = vmatmul.mubr.msk.f32.vlgmr.msra.gmra.mrb[18].mxu1 %vm1938_vm4, %v1922_v12 }
 0x424   :  { %4029 = vmatpush3.msk.msra.mxu1 %vm1942_vm2, %v4380_v9  ;;  %4030 = vmatprep.mubr.msk.f32.mxu1 %vm4266_vm1, %v4262_v0 }
 0x425   :  { %4038 = vmatprep.subr.mxu1 %v4262_v0 }
 0x426   :  { %v2031_v17 = vpop.trf.xlu0 }
 0x427   :  { %4026 = vmatmul.mubr.msk.f32.vlgmr.msra.gmra.mrb[18].mxu0 %vm1938_vm4, %v2031_v17 }
 0x428   :  { %4034 = vmatpush3.msk.msra.mxu0 %vm1942_vm2, %v4391_v18  ;;  %4035 = vmatprep.mubr.msk.f32.mxu0 %vm4266_vm1, %v4262_v0 }
 0x429   :  { %4043 = vmatprep.subr.mxu0 %v4262_v0 }
 0x42a   :  { %v2245_v19 = vpop.trf.xlu1 }
 0x42b   :  { %4036 = vmatmul.mubr.msk.f32.vlgmr.msra.gmra.mrb[20].mxu0 %vm1938_vm4, %v2245_v19  ;;  %v2138_v9 = vpop.trf.xlu0 }
 0x42c   :  { %4044 = vmatpush3.msk.msra.mxu0 %vm1942_vm2, %v4427_v39  ;;  %4045 = vmatprep.mubr.msk.f32.mxu0 %vm4266_vm1, %v4262_v0 }
 0x42d   :  { %4053 = vmatprep.subr.mxu0 %v4262_v0  ;;  %4031 = vmatmul.mubr.msk.f32.vlgmr.msra.gmra.mrb[20].mxu1 %vm1938_vm4, %v2138_v9 }
 0x42e   :  { %4039 = vmatpush3.msk.msra.mxu1 %vm1942_vm2, %v4401_v22  ;;  %4040 = vmatprep.mubr.msk.f32.mxu1 %vm4266_vm1, %v4262_v0 }
 0x42f   :  { %4048 = vmatprep.subr.mxu1 %v4262_v0  ;;  %v2352_v18 = vpop.trf.xlu0  ;;  %v2459_v26 = vpop.trf.xlu1 }
 0x430   :  { %4046 = vmatmul.mubr.msk.f32.vlgmr.msra.gmra.mrb[22].mxu0 %vm1938_vm4, %v2459_v26 }
 0x431   :  { %4041 = vmatmul.mubr.msk.f32.vlgmr.msra.gmra.mrb[22].mxu1 %vm1938_vm4, %v2352_v18  ;;  %4054 = vmatpush3.msk.msra.mxu0 %vm1942_vm2, %v4446_v48 }
 0x432   :  { %4049 = vmatpush3.msk.msra.mxu1 %vm1942_vm2, %v4416_v33  ;;  %4050 = vmatprep.mubr.msk.f32.mxu1 %vm4266_vm1, %v4262_v0 }
 0x433   :  { %4055 = vmatprep.mubr.msk.f32.mxu0 %vm4266_vm1, %v4262_v0  ;;  %4058 = vmatprep.subr.mxu1 %v4262_v0  ;;  %v2566_v22 = vpop.trf.xlu0  ;;  %v2673_v39 = vpop.trf.xlu1 }
 0x434   :  { %4063 = vmatprep.subr.mxu0 %v4262_v0  ;;  %4056 = vmatmul.mubr.msk.f32.vlgmr.msra.gmra.mrb[24].mxu0 %vm1938_vm4, %v2673_v39 }
 0x435   :  { %4051 = vmatmul.mubr.msk.f32.vlgmr.msra.gmra.mrb[24].mxu1 %vm1938_vm4, %v2566_v22  ;;  %4064 = vmatpush3.msk.msra.mxu0 %vm1942_vm2, %v4464_v54 }
 0x436   :  { %4059 = vmatpush3.msk.msra.mxu1 %vm1942_vm2, %v4441_v29  ;;  %4060 = vmatprep.mubr.msk.f32.mxu1 %vm4266_vm1, %v4262_v0 }
 0x437   :  { %4065 = vmatprep.mubr.msk.f32.mxu0 %vm4266_vm1, %v4262_v0  ;;  %4068 = vmatprep.subr.mxu1 %v4262_v0  ;;  %v2780_v33 = vpop.trf.xlu0  ;;  %v2887_v48 = vpop.trf.xlu1 }
 0x438   :  { %4073 = vmatprep.subr.mxu0 %v4262_v0  ;;  %4066 = vmatmul.mubr.msk.f32.vlgmr.msra.gmra.mrb[26].mxu0 %vm1938_vm4, %v2887_v48 }
 0x439   :  { %4061 = vmatmul.mubr.msk.f32.vlgmr.msra.gmra.mrb[26].mxu1 %vm1938_vm4, %v2780_v33  ;;  %4074 = vmatpush3.msk.msra.mxu0 %vm1942_vm2, %v4494_v62 }
 0x43a   :  { %4069 = vmatpush3.msk.msra.mxu1 %vm1942_vm2, %v4469_v55  ;;  %4070 = vmatprep.mubr.msk.f32.mxu1 %vm4266_vm1, %v4262_v0 }
 0x43b   :  { %4075 = vmatprep.mubr.msk.f32.mxu0 %vm4266_vm1, %v4262_v0  ;;  %4078 = vmatprep.subr.mxu1 %v4262_v0  ;;  %v2994_v29 = vpop.trf.xlu0  ;;  %v3101_v54 = vpop.trf.xlu1 }
 0x43c   :  { %4083 = vmatprep.subr.mxu0 %v4262_v0  ;;  %4076 = vmatmul.mubr.msk.f32.vlgmr.msra.gmra.mrb[28].mxu0 %vm1938_vm4, %v3101_v54 }
 0x43d   :  { %4071 = vmatmul.mubr.msk.f32.vlgmr.msra.gmra.mrb[28].mxu1 %vm1938_vm4, %v2994_v29  ;;  %4084 = vmatpush3.msk.msra.mxu0 %vm1942_vm2, %v4515_v3 }
 0x43e   :  { %4079 = vmatpush3.msk.msra.mxu1 %vm1942_vm2, %v4486_v61  ;;  %4080 = vmatprep.mubr.msk.f32.mxu1 %vm4266_vm1, %v4262_v0 }
 0x43f   :  { %4085 = vmatprep.mubr.msk.f32.mxu0 %vm4266_vm1, %v4262_v0  ;;  %4088 = vmatprep.subr.mxu1 %v4262_v0  ;;  %v3208_v55 = vpop.trf.xlu0  ;;  %v3315_v62 = vpop.trf.xlu1 }
 0x440   :  { %4093 = vmatprep.subr.mxu0 %v4262_v0  ;;  %4086 = vmatmul.mubr.msk.f32.vlgmr.msra.gmra.mrb[30].mxu0 %vm1938_vm4, %v3315_v62 }
 0x441   :  { %4081 = vmatmul.mubr.msk.f32.vlgmr.msra.gmra.mrb[30].mxu1 %vm1938_vm4, %v3208_v55  ;;  %4094 = vmatpush3.msk.msra.mxu0 %vm1942_vm2, %v4532_v5 }
 0x442   :  { %4089 = vmatpush3.msk.msra.mxu1 %vm1942_vm2, %v4507_v2  ;;  %4090 = vmatprep.mubr.msk.f32.mxu1 %vm4266_vm1, %v4262_v0 }
 0x443   :  { %4095 = vmatprep.mubr.msk.f32.mxu0 %vm4266_vm1, %v4262_v0  ;;  %v3422_v61 = vpop.trf.xlu0  ;;  %v3529_v3 = vpop.trf.xlu1 }
 0x444   :  { %4096 = vmatmul.mubr.msk.f32.vlgmr.msra.gmra.mrb[32].mxu0 %vm1938_vm4, %v3529_v3 }
 0x445   :  { %4091 = vmatmul.mubr.msk.f32.vlgmr.msra.gmra.mrb[32].mxu1 %vm1938_vm4, %v3422_v61 }
 0x4f6   :  { %v2011_v44 = vpop.f32.mrb[18].mxu1 }
 0x4f7   :  { %v4022_v8 = vpop.f32.mrb[19].mxu1 }
 0x4fa   :  { %v2118_v1 = vpop.f32.mrb[18].mxu0 }
 0x4fb   :  { %v4027_v63 = vpop.f32.mrb[19].mxu0 }
 0x4fe   :  { %v2332_v2 = vpop.f32.mrb[20].mxu0 }
 0x4ff   :  { %v3628_v10 = vcombine.low %v2118_v1, %v2332_v2  ;;  %v4037_v35 = vpop.f32.mrb[21].mxu0 }
 0x500   :  { %v2225_v5 = vpop.f32.mrb[20].mxu1 }
 0x501   :  { %v3620_v30 = vcombine.low %v2011_v44, %v2225_v5  ;;  %v3635_v57 = vrot.slane %v3628_v10, %v4357_v38  ;;  %v4032_v49 = vpop.f32.mrb[21].mxu1 }
 0x503   :  { %v3627_v0 = vrot.slane %v3620_v30, %v4357_v38  ;;  %v2546_v11 = vpop.f32.mrb[22].mxu0 }
 0x504   :  { %v2439_v21 = vpop.f32.mrb[22].mxu1  ;;  %v4047_v34 = vpop.f32.mrb[23].mxu0 }
 0x505   :  { %v3652_v24 = vcombine.low %v3627_v0, %v3635_v57  ;;  %v3653_v43 = vcombine.high %v3627_v0, %v3635_v57  ;;  %v4042_v27 = vpop.f32.mrb[23].mxu1 }
 0x507   :  { %v2760_v4 = vpop.f32.mrb[24].mxu0  ;;  %v3667_v52 = vrot.slane %v3653_v43, %v4359_v45  ;;  %v3660_v50 = vrot.slane %v3652_v24, %v4359_v45 }
 0x508   :  { %v2653_v23 = vpop.f32.mrb[24].mxu1  ;;  %v3644_v56 = vcombine.low %v2546_v11, %v2760_v4  ;;  %v4057_v28 = vpop.f32.mrb[25].mxu0 }
 0x509   :  { %v3636_v36 = vcombine.low %v2439_v21, %v2653_v23  ;;  %v4052_v41 = vpop.f32.mrb[25].mxu1 }
 0x50a   :  { %v3651_v42 = vrot.slane %v3644_v56, %v4357_v38 }
 0x50b   :  { %v3643_v51 = vrot.slane %v3636_v36, %v4357_v38  ;;  %v2974_v58 = vpop.f32.mrb[26].mxu0 }
 0x50c   :  { %v2867_v46 = vpop.f32.mrb[26].mxu1  ;;  %v4067_v15 = vpop.f32.mrb[27].mxu0 }
 0x50d   :  { %v4062_v32 = vpop.f32.mrb[27].mxu1  ;;  %v3668_v7 = vcombine.low %v3643_v51, %v3651_v42  ;;  %v3669_v37 = vcombine.high %v3643_v51, %v3651_v42 }
 0x50f   :  { %v3683_v16 = vrot.slane %v3669_v37, %v4359_v45  ;;  %v3676_v53 = vrot.slane %v3668_v7, %v4359_v45  ;;  %v3188_v47 = vpop.f32.mrb[28].mxu0 }
 0x510   :  { %v3081_v59 = vpop.f32.mrb[28].mxu1  ;;  %v3696_v6 = vcombine.low %v2974_v58, %v3188_v47  ;;  %v4077_v13 = vpop.f32.mrb[29].mxu0 }
 0x511   :  { %v3688_v25 = vcombine.low %v2867_v46, %v3081_v59  ;;  %v4072_v60 = vpop.f32.mrb[29].mxu1  ;;  %v3686_v40 = vcombine.low %v3667_v52, %v3683_v16  ;;  %v3685_v31 = vcombine.high %v3660_v50, %v3676_v53  ;;  %v3687_v20 = vcombine.high %v3667_v52, %v3683_v16 }
 0x512   :  { %v3684_v12 = vcombine.low %v3660_v50, %v3676_v53  ;;  %v3703_v17 = vrot.slane %v3696_v6, %v4357_v38 }
 0x513   :  { %v3695_v14 = vrot.slane %v3688_v25, %v4357_v38  ;;  %3766 = vrot.lane.b32.xlu1 %v3686_v40, %s4265_s19  ;;  %3758 = vrot.lane.b32.xlu0 %v3685_v31, %s4263_s17  ;;  %v3402_v9 = vpop.f32.mrb[30].mxu0 }
 0x514   :  { %v3295_v19 = vpop.f32.mrb[30].mxu1  ;;  %v4087_v39 = vpop.f32.mrb[31].mxu0 }
 0x515   :  { %v4082_v18 = vpop.f32.mrb[31].mxu1  ;;  %v3720_v26 = vcombine.low %v3695_v14, %v3703_v17  ;;  %v3721_v22 = vcombine.high %v3695_v14, %v3703_v17 }
 0x517   :  { %3774 = vrot.lane.b32.xlu0 %v3687_v20, %s4264_s18  ;;  %v3616_v29 = vpop.f32.mrb[32].mxu0  ;;  %v3728_v1 = vrot.slane %v3720_v26, %v4359_v45  ;;  %v3735_v2 = vrot.slane %v3721_v22, %v4359_v45 }
 0x518   :  { %v3509_v33 = vpop.f32.mrb[32].mxu1  ;;  %v3712_v55 = vcombine.low %v3402_v9, %v3616_v29  ;;  %v4097_v62 = vpop.f32.mrb[33].mxu0 }
 0x519   :  { %v3704_v48 = vcombine.low %v3295_v19, %v3509_v33  ;;  %v4092_v54 = vpop.f32.mrb[33].mxu1 }
 0x51a   :  { %v3719_v3 = vrot.slane %v3712_v55, %v4357_v38 }
 0x51b   :  { %v3711_v61 = vrot.slane %v3704_v48, %v4357_v38 }
 0x51d   :  { %v3736_v44 = vcombine.low %v3711_v61, %v3719_v3  ;;  %v3737_v8 = vcombine.high %v3711_v61, %v3719_v3 }
 0x51f   :  { %v3744_v63 = vrot.slane %v3736_v44, %v4359_v45  ;;  %v3751_v10 = vrot.slane %v3737_v8, %v4359_v45 }
 0x521   :  { %v3753_v35 = vcombine.high %v3728_v1, %v3744_v63  ;;  %v3754_v5 = vcombine.low %v3735_v2, %v3751_v10  ;;  %v3755_v30 = vcombine.high %v3735_v2, %v3751_v10  ;;  %v3752_v57 = vcombine.low %v3728_v1, %v3744_v63 }
 0x523   :  { %3760 = vrot.lane.b32.xlu1 %v3753_v35, %s4263_s17 }
 0x527   :  { %3768 = vrot.lane.b32.xlu1 %v3754_v5, %s4265_s19 }
 0x52b   :  { %3776 = vrot.lane.b32.xlu1 %v3755_v30, %s4264_s18 }
 0x585   :  { %v3759_v38 = vpop.permute.xlu0 %3758  ;;  %v3767_v49 = vpop.permute.xlu1 %3766 }
 0x586   :  { %v3780_v0 = vsel %vm68_vm0, %v3684_v12, %v3759_v38 }
 0x587   :  { %v3783_v21 = vsel %vm3782_vm5, %v3780_v0, %v3767_v49 }
 0x589   :  { %v3775_v24 = vpop.permute.xlu0 %3774 }
 0x58a   :  { %v3786_v43 = vsel %vm3785_vm6, %v3783_v21, %v3775_v24 }
 0x58b   :  { %3788 = vst [vmem:[#allocation7] sm:$0xff] %v3786_v43 }
 0x595   :  { %v3761_v45 = vpop.permute.xlu1 %3760 }
 0x596   :  { %v3781_v27 = vsel %vm68_vm0, %v3752_v57, %v3761_v45 }
 0x599   :  { %v3769_v11 = vpop.permute.xlu1 %3768 }
 0x59a   :  { %v3784_v34 = vsel %vm3782_vm5, %v3781_v27, %v3769_v11 }
 0x59d   :  { %v3777_v23 = vpop.permute.xlu1 %3776 }
 0x59e   :  { %v3787_v36 = vsel %vm3785_vm6, %v3784_v34, %v3777_v23 }
 0x59f   :  { %3789 = vst [vmem:[#allocation7 + $0x8] sm:$0xff] %v3787_v36 }
 0x5a0   :  { %4239 = shalt.err (!%p4236_p6)
}
 0x5a1   :  { %s4240_s27 = scalar_lea.hbm %s4867_s4, 256 }
 0x5a2   :  { %p4241_p7 = scmp.ne.s32.totalorder %s4867_s4, %s4240_s27  ;;  %p4244_p8 = scmp.lt.u32.totalorder %s4240_s27, %s4867_s4 }
 0x5a4   :  { %p4246_p9 = pnand %p4244_p8, %p4241_p7 }
 0x5a6   :  { %4249 = shalt.err (!%p4246_p9)
}
 0x5a7   :  { %3801 = dma.vmem_to_hbm [thread:$0]  %s3796_s21, 256, %s4867_s4, [#allocation4], %s4257_s25, %s4257_s25, %s4258_s26  }
 0x5a8   :  { %4254 = dma.done.wait [#allocation4], 256  }
 0x5a9   :  { %4255 = vsyncadd [#allocation4], 4294967040 }
 0x5aa   :  { %3805 = vsyncpa [#allocation3], 1 }
 0x5ab   :  { %3806 = vsyncpa [#allocation6], 1 }
 0x5ac   :  { %3807 = vsyncpa [#allocation4], 1 }

</bundles_post_ra>
